<compile_context>
chip_gen: v7x
topology: tpu7x:2x2x1
jax: 0.10.0
libtpu: 0.0.40
codegen_flags: <defaults>
</compile_context>

<pallas_src>
import functools

import jax
import jax.numpy as jnp
from jax import lax
from jax.experimental import pallas as pl
from jax.experimental.pallas import tpu as pltpu


def _maxpool_kernel(x_ref, o_ref, *, k, ho, wo):
    # x_ref: (P, Hc, Wc)  -- P independent (n, c) planes; H on sublanes, W on lanes
    # o_ref: (P, Ho, Wo)
    #
    # H pool first: k sublane-strided taps read directly from the ref
    # (strided vld path, no relayout), shrinking the data by k before any
    # lane-direction work.
    hmax = x_ref[:, pl.ds(0, ho, stride=k), :]
    for dy in range(1, k):
        hmax = jnp.maximum(hmax, x_ref[:, pl.ds(dy, ho, stride=k), :])

    # W (lane) pool on the already k-times-smaller (P, Ho, Wc) intermediate:
    # one reshape splitting the lane dim into (Wo, k) and a reduce over the
    # k taps. This is the only cross-lane work in the kernel.
    p = hmax.shape[0]
    out = jnp.max(hmax.reshape(p, ho, wo, k), axis=-1)
    o_ref[...] = out.astype(o_ref.dtype)


_TARGET_BLOCK_BYTES = 4 << 20   # ~4 MiB of input per grid step (safe on all gens)
_MAX_BLOCK_BYTES = 12 << 20     # keeps double-buffered in+out well inside VMEM
_MIN_GRID_STEPS = 8             # enough parallel steps to feed both v7x TCs


def _plane_block(nc, plane_bytes, itemsize):
    """Planes per grid step: ~4 MiB input, dtype-packing aligned, >=8 steps."""
    packing = max(1, (8 * 4) // itemsize)   # 8 for f32, 16 for bf16, 32 for int8
    if nc <= packing:
        return nc
    p = max(packing, min(nc, _TARGET_BLOCK_BYTES // max(plane_bytes, 1)))
    p -= p % packing
    # Keep at least ~_MIN_GRID_STEPS grid steps so the parallel axis can be
    # sharded across v7x's two TensorCores.
    if nc // p < _MIN_GRID_STEPS:
        cap = ((nc // _MIN_GRID_STEPS) // packing) * packing
        if cap >= packing:
            p = min(p, cap)
    # VMEM guard for very large planes (e.g. 512x512 f32 with min P).
    cap = max(1, _MAX_BLOCK_BYTES // max(plane_bytes, 1))
    if cap < p:
        p = max(1, cap - cap % packing) if cap >= packing else cap
    # TODO(synk): for single planes larger than _MAX_BLOCK_BYTES, add a second
    # grid axis tiling H in k-aligned chunks instead of shrinking P below 1.
    return max(1, min(p, nc))


def maxpool2d(x_nchw, *, kernel_size, stride):
    """nn.MaxPool2d(kernel_size, stride) forward. NCHW in, NCHW out."""
    if stride != kernel_size:
        # TODO(synk): overlapping windows (stride != kernel_size) not implemented.
        raise NotImplementedError("maxpool2d requires stride == kernel_size")
    k = int(kernel_size)
    n, c, h, w = x_nchw.shape
    ho, wo = (h - k) // k + 1, (w - k) // k + 1      # floor mode, no padding
    hc, wc = ho * k, wo * k

    x = x_nchw
    if (hc, wc) != (h, w):
        x = x[:, :, :hc, :wc]                        # floor-mode crop (rare)

    nc = n * c
    x3 = x.reshape(nc, hc, wc)                       # contiguous collapse: free

    itemsize = jnp.dtype(x3.dtype).itemsize
    plane_bytes = hc * wc * itemsize
    p = _plane_block(nc, plane_bytes, itemsize)
    grid = (pl.cdiv(nc, p),)

    in_block_bytes = p * plane_bytes
    out_block_bytes = p * ho * wo * itemsize
    # Double-buffered in/out plus the in-kernel intermediate, with headroom,
    # kept under v7x's 64 MiB physical VMEM.
    vmem_limit = int(min(48 << 20,
                         max(32 << 20, 3 * (in_block_bytes + out_block_bytes))))

    cost = pl.CostEstimate(
        flops=nc * ho * wo * max(k * k - 1, 1),      # comparisons
        transcendentals=0,
        bytes_accessed=nc * (hc * wc + ho * wo) * itemsize,
    )

    out3 = pl.pallas_call(
        functools.partial(_maxpool_kernel, k=k, ho=ho, wo=wo),
        out_shape=jax.ShapeDtypeStruct((nc, ho, wo), x3.dtype),
        grid_spec=pltpu.PrefetchScalarGridSpec(
            num_scalar_prefetch=0,
            grid=grid,
            in_specs=[pl.BlockSpec((p, hc, wc), lambda i: (i, 0, 0))],
            out_specs=pl.BlockSpec((p, ho, wo), lambda i: (i, 0, 0)),
        ),
        compiler_params=pltpu.CompilerParams(
            dimension_semantics=("parallel",),
            vmem_limit_bytes=vmem_limit),
        cost_estimate=cost,
    )(x3)

    return out3.reshape(n, c, ho, wo)                # contiguous expand: free


if __name__ == "__main__":
    key = jax.random.PRNGKey(0)

    # MaxPool module config as used in VGG16: kernel_size=2, stride=2.
    cases = [
        ((2, 4, 16, 16), 2),    # main case: even spatial, grid divides evenly
        ((2, 5, 14, 14), 2),    # nc % block != 0 -> trailing partial block
        ((1, 3, 17, 17), 2),    # odd spatial dims -> floor-mode crop
    ]

    for idx, (shape, k) in enumerate(cases):
        x = jax.random.normal(jax.random.fold_in(key, idx), shape,
                              dtype=jnp.float32)
        out = jax.block_until_ready(maxpool2d(x, kernel_size=k, stride=k))

        # Reference (plain JAX) for a sanity check of the Pallas kernel.
        ref = lax.reduce_window(
            x, -jnp.inf, lax.max,
            window_dimensions=(1, 1, k, k),
            window_strides=(1, 1, k, k),
            padding="VALID")

        assert out.shape == ref.shape, (shape, out.shape, ref.shape)
        assert bool(jnp.array_equal(out, ref)), (
            shape, float(jnp.max(jnp.abs(out - ref))))

    print("KERNEL_OK")
</pallas_src>

<mosaic_0001>
module attributes {stable_mosaic.version = 11 : i64} {
  func.func @_maxpool_kernel(%arg0: i32, %arg1: memref<8x16x16xf32, #tpu.memory_space<vmem>>, %arg2: memref<8x8x8xf32, #tpu.memory_space<vmem>>) attributes {dimension_semantics = [#tpu.dimension_semantics<parallel>], iteration_bounds = array<i64: 1>, scalar_prefetch = 0 : i64, scratch_operands = 0 : i64, tpu.core_type = #tpu.core_type<tc>, window_params = [{transform_indices = @transform_0, window_bounds = array<i64: 8, 16, 16>}, {transform_indices = @transform_1, window_bounds = array<i64: 8, 8, 8>}]} {
    %c0 = arith.constant 0 : index
    %c0_0 = arith.constant 0 : index
    %c0_1 = arith.constant 0 : index
    %0 = tpu.strided_load %arg1[%c0, %c0_0, %c0_1] {strides = array<i32: 1, 2, 1>} : memref<8x16x16xf32, #tpu.memory_space<vmem>>, vector<8x8x16xf32>
    %c0_2 = arith.constant 0 : index
    %c1 = arith.constant 1 : index
    %c0_3 = arith.constant 0 : index
    %1 = tpu.strided_load %arg1[%c0_2, %c1, %c0_3] {strides = array<i32: 1, 2, 1>} : memref<8x16x16xf32, #tpu.memory_space<vmem>>, vector<8x8x16xf32>
    %2 = arith.maximumf %0, %1 : vector<8x8x16xf32>
    %3 = vector.shape_cast %2 : vector<8x8x16xf32> to vector<8x8x8x2xf32>
    %cst = arith.constant dense<0xFF800000> : vector<8x8x8xf32>
    %4 = vector.multi_reduction <maximumf>, %3, %cst [3] : vector<8x8x8x2xf32> to vector<8x8x8xf32>
    %c0_4 = arith.constant 0 : index
    %c0_5 = arith.constant 0 : index
    %c0_6 = arith.constant 0 : index
    %5 = vector.load %arg2[%c0_4, %c0_5, %c0_6] : memref<8x8x8xf32, #tpu.memory_space<vmem>>, vector<8x8x8xf32>
    tpu.vector_store %arg2[%c0_4, %c0_5, %c0_6], %4 {strides = array<i32>} : memref<8x8x8xf32, #tpu.memory_space<vmem>>, vector<8x8x8xf32>,
    return
  }
  func.func @transform_0(%arg0: i32) -> (i32, i32, i32) {
    %c0_i32 = arith.constant 0 : i32
    %c0_i32_0 = arith.constant 0 : i32
    %c0_i32_1 = arith.constant 0 : i32
    return %arg0, %c0_i32, %c0_i32_0 : i32, i32, i32
  }
  func.func @transform_1(%arg0: i32) -> (i32, i32, i32) {
    %c0_i32 = arith.constant 0 : i32
    %c0_i32_0 = arith.constant 0 : i32
    %c0_i32_1 = arith.constant 0 : i32
    return %arg0, %c0_i32, %c0_i32_0 : i32, i32, i32
  }
}

</mosaic_0001>

<bundles_post_ra>
// kernel: tpu_custom_call.1
= control target key start
LH: loop header
LB: loop body
LE: loop exit
PB: predicated region body
PF: predicated region fallthrough
CT: control target
= control target key end

     0   :  { %6 = vsyncpa [#allocation3], 0  ;;  %s3246_s0 = inlined_call_operand.hbm [shape: f32[8,16,16], index: 0, kind: input, shape index: {}]   ;;  %s3247_s1 = inlined_call_operand.hbm [shape: f32[8,8,8], index: 1, kind: output, shape index: {}]  }
   0x1   :  { %7 = vsyncpa [#allocation4], 0  ;;  %s1999_s6 = smov [#allocation2]   ;;  %s1951_s10 = scalar_lea.hbm %s3246_s0, 2048 }
   0x2   :  { %s13_s7 = sshll.u32 %s1999_s6, 4  ;;  %p1952_p0 = scmp.ne.s32.totalorder %s3246_s0, %s1951_s10  ;;  %s14_s7 = int_to_ptr.vmem [resolvable:$true] %s13_s7 }
   0x3   :  { %p1955_p1 = scmp.lt.u32.totalorder %s1951_s10, %s3246_s0 }
   0x5   :  { %p1957_p2 = pnand %p1955_p1, %p1952_p0 }
   0x7   :  { %1960 = shalt.err (!%p1957_p2)
}
   0x8   :  { %s1961_s15 = scalar_lea.vmem %s14_s7, 2048  ;;  %p1966_p4 = scmp.lt.s32.totalorder %s14_s7, %s14_s7 }
   0x9   :  { %p1962_p3 = scmp.ne.s32.totalorder %s14_s7, %s1961_s15  ;;  %p1967_p5 = scmp.lt.s32.totalorder %s1961_s15, %s1961_s15 }
   0xb   :  { %p1968_p6 = por %p1967_p5, %p1966_p4 }
   0xd   :  { %p1969_p7 = pnand %p1968_p6, %p1962_p3 }
   0xf   :  { %1972 = shalt.err (!%p1969_p7)
}
  0x10   :  { %s2000_s16 = smov 128   ;;  %s2001_s17 = smov 8  }
  0x11   :  { %19 = dma.hbm_to_vmem [thread:$0]  %s3246_s0, 2048, %s14_s7, [#allocation3], %s2000_s16, %s2000_s16, %s2001_s17  }
  0x12   :  { %1995 = dma.done.wait [#allocation3], 2048  }
  0x13   :  { %1996 = vsyncadd [#allocation3], 4294965248  ;;  %v27_v0 = vld [vmem:[#allocation2 + $0x20] ss:$2 sm:$0xff]  ;;  %v43_v1 = vld [vmem:[#allocation2 + $0x21] ss:$2 sm:$0xff]  ;;  %v3248_v54 = vlaneseq }
  0x14   :  { %v23_v2 = vld [vmem:[#allocation2] ss:$2 sm:$0xff]  ;;  %v2037_v3 = vmax.f32 %v27_v0, %v43_v1  ;;  %v39_v4 = vld [vmem:[#allocation2 + $0x1] ss:$2 sm:$0xff]  ;;  %v29_v5 = vld [vmem:[#allocation2 + $0x30] ss:$2 sm:$0xff] }
  0x15   :  { %v45_v6 = vld [vmem:[#allocation2 + $0x31] ss:$2 sm:$0xff]  ;;  %v2039_v7 = vmax.f32 %v23_v2, %v39_v4  ;;  %v25_v8 = vld [vmem:[#allocation2 + $0x10] ss:$2 sm:$0xff]  ;;  %s2002_s20 = smov 126   ;;  %s2003_s0 = smov 124  }
  0x16   :  { %v41_v9 = vld [vmem:[#allocation2 + $0x11] ss:$2 sm:$0xff]  ;;  %74 = vrot.lane.b32.xlu1 %v2037_v3, %s2002_s20  ;;  %v2042_v10 = vmax.f32 %v29_v5, %v45_v6  ;;  %v33_v12 = vld [vmem:[#allocation2 + $0x50] ss:$2 sm:$0xff]  ;;  %v31_v14 = vld [vmem:[#allocation2 + $0x40] ss:$2 sm:$0xff] }
  0x17   :  { %70 = vrot.lane.b32.xlu0 %v2039_v7, %s2002_s20  ;;  %v2045_v11 = vmax.f32 %v25_v8, %v41_v9  ;;  %v49_v13 = vld [vmem:[#allocation2 + $0x51] ss:$2 sm:$0xff]  ;;  %v47_v15 = vld [vmem:[#allocation2 + $0x41] ss:$2 sm:$0xff]  ;;  %v37_v18 = vld [vmem:[#allocation2 + $0x70] ss:$2 sm:$0xff] }
  0x18   :  { %v2048_v16 = vmax.f32 %v33_v12, %v49_v13  ;;  %v2051_v17 = vmax.f32 %v31_v14, %v47_v15  ;;  %v53_v19 = vld [vmem:[#allocation2 + $0x71] ss:$2 sm:$0xff]  ;;  %v35_v20 = vld [vmem:[#allocation2 + $0x60] ss:$2 sm:$0xff]  ;;  %v51_v21 = vld [vmem:[#allocation2 + $0x61] ss:$2 sm:$0xff] }
  0x19   :  { %v2054_v22 = vmax.f32 %v37_v18, %v53_v19  ;;  %v2057_v23 = vmax.f32 %v35_v20, %v51_v21  ;;  %s2004_s21 = smov 122   ;;  %s2005_s22 = smov 120   ;;  %v2009_v52 = vmov 1983009808   ;;  %v2010_v57 = vmov 1934713408  }
  0x1a   :  { %76 = vrot.lane.b32.xlu1 %v2042_v10, %s2002_s20  ;;  %s2006_s23 = smov 118   ;;  %s2007_s24 = smov 116   ;;  %v241_v53 = vunpack.c.l.s4 %v2009_v52  ;;  %v305_v58 = vunpack.c.l.s4 %v2010_v57  ;;  %v2160_v60 = vshrl.u32 %v3248_v54, 7  ;;  %vm1326_vm0 = vcmask 15360  }
  0x1b   :  { %72 = vrot.lane.b32.xlu0 %v2045_v11, %s2002_s20  ;;  %s2008_s25 = smov 114   ;;  %vm1841_vm1 = vcmask 1041409   ;;  %vm1843_vm2 = vcmask 1042434   ;;  %vm1845_vm3 = vcmask 1043459   ;;  %vm1847_vm4 = vcmask 1044484   ;;  %s2011_s26 = smov [#allocation5]  }
  0x1c   :  { %v242_v59 = vunpack.c.0.s8 %v241_v53  ;;  %3271 = vst [vmem:[#allocation8_spill] sm:$0xff] %v2160_v60  ;;  %v306_v0 = vunpack.c.0.s8 %v305_v58  ;;  %vm1849_vm5 = vcmask 1045509   ;;  %vm1851_vm6 = vcmask 1046534   ;;  %s1926_s27 = sshll.u32 %s2011_s26, 4  ;;  %s1927_s27 = int_to_ptr.vmem [resolvable:$true] %s1926_s27 }
  0x1d   :  { %vm1853_vm7 = vcmask 1047559   ;;  %vm1912_vm8 = vcmask 64512   ;;  %s1973_s28 = scalar_lea.vmem %s1927_s27, 1024  ;;  %p1978_p9 = scmp.lt.s32.totalorder %s1927_s27, %s1927_s27 }
  0x1e   :  { %80 = vrot.lane.b32.xlu1 %v2048_v16, %s2002_s20  ;;  %v2169_v2 = vsub.s32 %v242_v59, %v2160_v60  ;;  %p1974_p8 = scmp.ne.s32.totalorder %s1927_s27, %s1973_s28  ;;  %p1979_p10 = scmp.lt.s32.totalorder %s1973_s28, %s1973_s28 }
  0x1f   :  { %78 = vrot.lane.b32.xlu0 %v2051_v17, %s2002_s20 }
  0x20   :  { %p1980_p11 = por %p1979_p10, %p1978_p9 }
  0x22   :  { %84 = vrot.lane.b32.xlu1 %v2054_v22, %s2002_s20  ;;  %p1981_p12 = pnand %p1980_p11, %p1974_p8 }
  0x23   :  { %82 = vrot.lane.b32.xlu0 %v2057_v23, %s2002_s20 }
  0x26   :  { %96 = vrot.lane.b32.xlu1 %v2045_v11, %s2003_s0 }
  0x27   :  { %94 = vrot.lane.b32.xlu0 %v2039_v7, %s2003_s0 }
  0x2a   :  { %100 = vrot.lane.b32.xlu1 %v2042_v10, %s2003_s0 }
  0x2b   :  { %98 = vrot.lane.b32.xlu0 %v2037_v3, %s2003_s0 }
  0x2e   :  { %104 = vrot.lane.b32.xlu1 %v2048_v16, %s2003_s0 }
  0x2f   :  { %102 = vrot.lane.b32.xlu0 %v2051_v17, %s2003_s0 }
  0x32   :  { %108 = vrot.lane.b32.xlu1 %v2054_v22, %s2003_s0 }
  0x33   :  { %106 = vrot.lane.b32.xlu0 %v2057_v23, %s2003_s0 }
  0x36   :  { %120 = vrot.lane.b32.xlu1 %v2045_v11, %s2004_s21 }
  0x37   :  { %118 = vrot.lane.b32.xlu0 %v2039_v7, %s2004_s21 }
  0x3a   :  { %124 = vrot.lane.b32.xlu1 %v2042_v10, %s2004_s21 }
  0x3b   :  { %122 = vrot.lane.b32.xlu0 %v2037_v3, %s2004_s21 }
  0x3e   :  { %128 = vrot.lane.b32.xlu1 %v2048_v16, %s2004_s21 }
  0x3f   :  { %126 = vrot.lane.b32.xlu0 %v2051_v17, %s2004_s21 }
  0x42   :  { %132 = vrot.lane.b32.xlu1 %v2054_v22, %s2004_s21 }
  0x43   :  { %130 = vrot.lane.b32.xlu0 %v2057_v23, %s2004_s21 }
  0x46   :  { %144 = vrot.lane.b32.xlu1 %v2045_v11, %s2005_s22 }
  0x47   :  { %142 = vrot.lane.b32.xlu0 %v2039_v7, %s2005_s22 }
  0x4a   :  { %148 = vrot.lane.b32.xlu1 %v2042_v10, %s2005_s22 }
  0x4b   :  { %146 = vrot.lane.b32.xlu0 %v2037_v3, %s2005_s22 }
  0x4e   :  { %152 = vrot.lane.b32.xlu1 %v2048_v16, %s2005_s22 }
  0x4f   :  { %150 = vrot.lane.b32.xlu0 %v2051_v17, %s2005_s22 }
  0x52   :  { %156 = vrot.lane.b32.xlu1 %v2054_v22, %s2005_s22 }
  0x53   :  { %154 = vrot.lane.b32.xlu0 %v2057_v23, %s2005_s22 }
  0x56   :  { %168 = vrot.lane.b32.xlu1 %v2045_v11, %s2006_s23 }
  0x57   :  { %166 = vrot.lane.b32.xlu0 %v2039_v7, %s2006_s23 }
  0x5a   :  { %172 = vrot.lane.b32.xlu1 %v2042_v10, %s2006_s23 }
  0x5b   :  { %170 = vrot.lane.b32.xlu0 %v2037_v3, %s2006_s23 }
  0x5e   :  { %176 = vrot.lane.b32.xlu1 %v2048_v16, %s2006_s23 }
  0x5f   :  { %174 = vrot.lane.b32.xlu0 %v2051_v17, %s2006_s23 }
  0x62   :  { %180 = vrot.lane.b32.xlu1 %v2054_v22, %s2006_s23 }
  0x63   :  { %178 = vrot.lane.b32.xlu0 %v2057_v23, %s2006_s23 }
  0x66   :  { %192 = vrot.lane.b32.xlu1 %v2045_v11, %s2007_s24 }
  0x67   :  { %190 = vrot.lane.b32.xlu0 %v2039_v7, %s2007_s24 }
  0x6a   :  { %196 = vrot.lane.b32.xlu1 %v2042_v10, %s2007_s24 }
  0x6b   :  { %194 = vrot.lane.b32.xlu0 %v2037_v3, %s2007_s24 }
  0x6e   :  { %200 = vrot.lane.b32.xlu1 %v2048_v16, %s2007_s24 }
  0x6f   :  { %198 = vrot.lane.b32.xlu0 %v2051_v17, %s2007_s24 }
  0x72   :  { %204 = vrot.lane.b32.xlu1 %v2054_v22, %s2007_s24 }
  0x73   :  { %202 = vrot.lane.b32.xlu0 %v2057_v23, %s2007_s24 }
  0x76   :  { %216 = vrot.lane.b32.xlu1 %v2045_v11, %s2008_s25 }
  0x77   :  { %214 = vrot.lane.b32.xlu0 %v2039_v7, %s2008_s25 }
  0x7a   :  { %220 = vrot.lane.b32.xlu1 %v2042_v10, %s2008_s25 }
  0x7b   :  { %218 = vrot.lane.b32.xlu0 %v2037_v3, %s2008_s25 }
  0x7e   :  { %224 = vrot.lane.b32.xlu1 %v2048_v16, %s2008_s25 }
  0x7f   :  { %222 = vrot.lane.b32.xlu0 %v2051_v17, %s2008_s25 }
  0x82   :  { %228 = vrot.lane.b32.xlu1 %v2054_v22, %s2008_s25 }
  0x83   :  { %226 = vrot.lane.b32.xlu0 %v2057_v23, %s2008_s25 }
  0x88   :  { %v2109_v24 = vpop.permute.xlu1 %74 }
  0x89   :  { %v2111_v25 = vpop.permute.xlu0 %70 }
  0x8c   :  { %v2113_v26 = vpop.permute.xlu1 %76 }
  0x8d   :  { %v2115_v27 = vpop.permute.xlu0 %72 }
  0x90   :  { %v2117_v28 = vpop.permute.xlu1 %80 }
  0x91   :  { %v2119_v29 = vpop.permute.xlu0 %78 }
  0x94   :  { %v2121_v30 = vpop.permute.xlu1 %84 }
  0x95   :  { %v2123_v31 = vpop.permute.xlu0 %82 }
  0x98   :  { %v97_v32 = vpop.permute.xlu1 %96 }
  0x99   :  { %v95_v33 = vpop.permute.xlu0 %94  ;;  %v374_v62 = vcombine.low %v2045_v11, %v97_v32  ;;  %v375_v1 = vcombine.high %v2045_v11, %v97_v32  ;;  %v2183_v11 = vsub.s32 %v306_v0, %v2160_v60 }
  0x9a   :  { %v238_v4 = vcombine.low %v2039_v7, %v95_v33  ;;  %v239_v5 = vcombine.high %v2039_v7, %v95_v33 }
  0x9b   :  { %v2177_v9 = vrot.slane %v374_v62, %v2169_v2  ;;  %v2186_v14 = vrot.slane %v375_v1, %v2169_v2 }
  0x9c   :  { %v101_v34 = vpop.permute.xlu1 %100  ;;  %v2192_v19 = vrot.slane %v238_v4, %v2169_v2  ;;  %v2195_v20 = vrot.slane %v239_v5, %v2169_v2 }
  0x9d   :  { %v99_v35 = vpop.permute.xlu0 %98  ;;  %v646_v6 = vcombine.low %v2042_v10, %v101_v34  ;;  %v647_v12 = vcombine.high %v2042_v10, %v101_v34 }
  0x9e   :  { %v510_v15 = vcombine.low %v2037_v3, %v99_v35  ;;  %v511_v7 = vcombine.high %v2037_v3, %v99_v35 }
  0x9f   :  { %v2201_v32 = vrot.slane %v646_v6, %v2169_v2  ;;  %v2212_v52 = vrot.slane %v647_v12, %v2169_v2 }
  0xa0   :  { %v2125_v36 = vpop.permute.xlu1 %104  ;;  %v2223_v53 = vrot.slane %v510_v15, %v2169_v2  ;;  %v2226_v57 = vrot.slane %v511_v7, %v2169_v2 }
  0xa1   :  { %v2127_v37 = vpop.permute.xlu0 %102  ;;  %v918_v10 = vcombine.low %v2048_v16, %v2125_v36  ;;  %v919_v33 = vcombine.high %v2048_v16, %v2125_v36 }
  0xa2   :  { %v782_v3 = vcombine.low %v2051_v17, %v2127_v37 }
  0xa3   :  { %v2240_v62 = vrot.slane %v919_v33, %v2169_v2 }
  0xa4   :  { %v2129_v38 = vpop.permute.xlu1 %108  ;;  %v2243_v0 = vrot.slane %v782_v3, %v2169_v2 }
  0xa5   :  { %v2131_v39 = vpop.permute.xlu0 %106  ;;  %v1191_v16 = vcombine.high %v2054_v22, %v2129_v38 }
  0xa6   :  { %v1054_v58 = vcombine.low %v2057_v23, %v2131_v39 }
  0xa7   :  { %v2257_v6 = vrot.slane %v1191_v16, %v2169_v2 }
  0xa8   :  { %v2133_v40 = vpop.permute.xlu1 %120 }
  0xa9   :  { %v119_v41 = vpop.permute.xlu0 %118  ;;  %v390_v34 = vcombine.low %v2115_v27, %v2133_v40  ;;  %v391_v1 = vcombine.high %v2115_v27, %v2133_v40  ;;  %v2264_v27 = vrot.slane %v1054_v58, %v2169_v2 }
  0xaa   :  { %v254_v18 = vcombine.low %v2111_v25, %v119_v41  ;;  %v255_v21 = vcombine.high %v2111_v25, %v119_v41  ;;  %v783_v25 = vcombine.high %v2051_v17, %v2127_v37  ;;  %v1190_v41 = vcombine.low %v2054_v22, %v2129_v38 }
  0xab   :  { %v2232_v17 = vrot.slane %v918_v10, %v2169_v2  ;;  %v1055_v37 = vcombine.high %v2057_v23, %v2131_v39  ;;  %v398_v4 = vrot.slane %v390_v34, %v2169_v2  ;;  %3272 = vst [vmem:[#allocation9_spill] sm:$0xff] %v2264_v27  ;;  %v405_v33 = vrot.slane %v391_v1, %v2169_v2 }
  0xac   :  { %v2135_v42 = vpop.permute.xlu1 %124  ;;  %v262_v59 = vrot.slane %v254_v18, %v2169_v2  ;;  %v269_v22 = vrot.slane %v255_v21, %v2169_v2  ;;  %v2251_v23 = vrot.slane %v783_v25, %v2169_v2  ;;  %v2254_v39 = vrot.slane %v1190_v41, %v2169_v2 }
  0xad   :  { %v2137_v43 = vpop.permute.xlu0 %122  ;;  %v663_v38 = vcombine.high %v2113_v26, %v2135_v42  ;;  %v662_v12 = vcombine.low %v2113_v26, %v2135_v42  ;;  %v2272_v10 = vrot.slane %v1055_v37, %v2169_v2 }
  0xae   :  { %v526_v40 = vcombine.low %v2109_v24, %v2137_v43  ;;  %v527_v7 = vcombine.high %v2109_v24, %v2137_v43  ;;  %v302_v18 = vcombine.low %v2192_v19, %v262_v59  ;;  %v318_v42 = vcombine.low %v2195_v20, %v269_v22 }
  0xaf   :  { %v2275_v21 = vrot.slane %v663_v38, %v2169_v2  ;;  %v438_v24 = vcombine.low %v2177_v9, %v398_v4  ;;  %v439_v43 = vcombine.high %v2177_v9, %v398_v4  ;;  %v2288_v25 = vrot.slane %v662_v12, %v2169_v2 }
  0xb0   :  { %v2139_v44 = vpop.permute.xlu1 %128  ;;  %v303_v58 = vcombine.high %v2192_v19, %v262_v59  ;;  %v319_v37 = vcombine.high %v2195_v20, %v269_v22  ;;  %v2301_v9 = vrot.slane %v302_v18, %v2183_v11  ;;  %v2311_v20 = vrot.slane %v318_v42, %v2183_v11 }
  0xb1   :  { %v2141_v45 = vpop.permute.xlu0 %126  ;;  %v934_v26 = vcombine.low %v2117_v28, %v2139_v44  ;;  %v935_v3 = vcombine.high %v2117_v28, %v2139_v44  ;;  %v534_v28 = vrot.slane %v526_v40, %v2169_v2  ;;  %v541_v44 = vrot.slane %v527_v7, %v2169_v2 }
  0xb2   :  { %v799_v41 = vcombine.high %v2119_v29, %v2141_v45  ;;  %v798_v38 = vcombine.low %v2119_v29, %v2141_v45  ;;  %v2330_v18 = vrot.slane %v303_v58, %v2183_v11  ;;  %v454_v42 = vcombine.low %v2186_v14, %v405_v33 }
  0xb3   :  { %v2306_v4 = vrot.slane %v934_v26, %v2169_v2  ;;  %v2316_v29 = vrot.slane %v935_v3, %v2169_v2  ;;  %v2333_v26 = vrot.slane %v319_v37, %v2183_v11  ;;  %v2341_v3 = vrot.slane %v439_v43, %v2183_v11 }
  0xb4   :  { %v2143_v46 = vpop.permute.xlu1 %132  ;;  %v2325_v40 = vrot.slane %v799_v41, %v2169_v2  ;;  %v455_v41 = vcombine.high %v2186_v14, %v405_v33  ;;  %v575_v43 = vcombine.high %v2223_v53, %v534_v28  ;;  %v591_v60 = vcombine.high %v2226_v57, %v541_v44 }
  0xb5   :  { %v2145_v47 = vpop.permute.xlu0 %130  ;;  %v1206_v19 = vcombine.low %v2121_v30, %v2143_v46  ;;  %v1207_v45 = vcombine.high %v2121_v30, %v2143_v46  ;;  %v806_v30 = vrot.slane %v798_v38, %v2169_v2  ;;  %v2338_v46 = vrot.slane %v438_v24, %v2183_v11  ;;  %3273 = vst [vmem:[#allocation10_spill] sm:$0xff] %v2341_v3 }
  0xb6   :  { %v1071_v22 = vcombine.high %v2123_v31, %v2145_v47  ;;  %v982_v54 = vcombine.low %v2232_v17, %v2306_v4  ;;  %v983_v58 = vcombine.high %v2232_v17, %v2306_v4  ;;  %v1070_v59 = vcombine.low %v2123_v31, %v2145_v47 }
  0xb7   :  { %v1214_v37 = vrot.slane %v1206_v19, %v2169_v2  ;;  %v2356_v38 = vrot.slane %v1207_v45, %v2169_v2  ;;  %v2372_v19 = vrot.slane %v454_v42, %v2183_v11  ;;  %v2375_v45 = vrot.slane %v455_v41, %v2183_v11 }
  0xb8   :  { %v2147_v48 = vpop.permute.xlu1 %144  ;;  %v2359_v14 = vrot.slane %v1071_v22, %v2169_v2  ;;  %v574_v22 = vcombine.low %v2223_v53, %v534_v28  ;;  %v590_v24 = vcombine.low %v2226_v57, %v541_v44  ;;  %v2383_v17 = vrot.slane %v1070_v59, %v2169_v2 }
  0xb9   :  { %v2149_v49 = vpop.permute.xlu0 %142  ;;  %3274 = vst [vmem:[#allocation11_spill] sm:$0xff] %v2356_v38  ;;  %3275 = vst [vmem:[#allocation12_spill] sm:$0xff] %v2372_v19  ;;  %v1254_v1 = vcombine.low %v2254_v39, %v1214_v37  ;;  %v1255_v31 = vcombine.high %v2254_v39, %v1214_v37  ;;  %v710_v59 = vcombine.low %v2201_v32, %v2288_v25 }
  0xba   :  { %3276 = vst [vmem:[#allocation13_spill] sm:$0xff] %v2375_v45  ;;  %3277 = vst [vmem:[#allocation14_spill] sm:$0xff] %v2383_v17  ;;  %v846_v57 = vcombine.low %v2243_v0, %v806_v30  ;;  %v847_v44 = vcombine.high %v2243_v0, %v806_v30  ;;  %v2401_v41 = vrot.slane %v574_v22, %v2183_v11 }
  0xbb   :  { %v2404_v53 = vrot.slane %v575_v43, %v2183_v11  ;;  %v2407_v28 = vrot.slane %v590_v24, %v2183_v11  ;;  %v2410_v19 = vrot.slane %v591_v60, %v2183_v11  ;;  %v2413_v3 = vrot.slane %v982_v54, %v2183_v11 }
  0xbc   :  { %v2151_v50 = vpop.permute.xlu1 %148  ;;  %v2416_v38 = vrot.slane %v1254_v1, %v2183_v11  ;;  %v1119_v0 = vcombine.high %v2264_v27, %v2383_v17  ;;  %v711_v54 = vcombine.high %v2201_v32, %v2288_v25  ;;  %v2433_v27 = vrot.slane %v846_v57, %v2183_v11 }
  0xbd   :  { %v2153_v51 = vpop.permute.xlu0 %146  ;;  %3278 = vst [vmem:[#allocation15_spill] sm:$0xff] %v2410_v19  ;;  %v2430_v19 = vrot.slane %v710_v59, %v2183_v11  ;;  %v2436_v17 = vrot.slane %v847_v44, %v2183_v11  ;;  %v2445_v32 = vrot.slane %v1255_v31, %v2183_v11 }
  0xbe   :  { %3279 = vst [vmem:[#allocation16_spill] sm:$0xff] %v2416_v38  ;;  %3281 = vst [vmem:[#allocation18_spill] sm:$0xff] %v2433_v27  ;;  %v2442_v38 = vrot.slane %v983_v58, %v2183_v11  ;;  %v2453_v44 = vrot.slane %v1119_v0, %v2183_v11  ;;  %v2463_v27 = vrot.slane %v711_v54, %v2183_v11 }
  0xbf   :  { %3280 = vst [vmem:[#allocation17_spill] sm:$0xff] %v2430_v19  ;;  %3283 = vst [vmem:[#allocation20_spill] sm:$0xff] %v2445_v32 }
  0xc0   :  { %v2155_v55 = vpop.permute.xlu1 %152  ;;  %3282 = vst [vmem:[#allocation19_spill] sm:$0xff] %v2442_v38  ;;  %3284 = vst [vmem:[#allocation21_spill] sm:$0xff] %v2453_v44 }
  0xc1   :  { %v2157_v56 = vpop.permute.xlu0 %150  ;;  %3285 = vst [vmem:[#allocation22_spill] sm:$0xff] %v2463_v27 }
  0xc4   :  { %v2162_v61 = vpop.permute.xlu1 %156 }
  0xc5   :  { %v2165_v63 = vpop.permute.xlu0 %154 }
  0xc8   :  { %v2174_v8 = vpop.permute.xlu1 %168 }
  0xc9   :  { %v2180_v13 = vpop.permute.xlu0 %166 }
  0xcc   :  { %v2209_v35 = vpop.permute.xlu1 %172 }
  0xcd   :  { %v2220_v36 = vpop.permute.xlu0 %170 }
  0xd0   :  { %v2248_v5 = vpop.permute.xlu1 %176 }
  0xd1   :  { %v2261_v15 = vpop.permute.xlu0 %174 }
  0xd4   :  { %v2283_v34 = vpop.permute.xlu1 %180 }
  0xd5   :  { %v2292_v16 = vpop.permute.xlu0 %178 }
  0xd8   :  { %v2322_v12 = vpop.permute.xlu1 %192 }
  0xd9   :  { %v2327_v7 = vpop.permute.xlu0 %190  ;;  %v406_v30 = vcombine.low %v2147_v48, %v2322_v12  ;;  %v407_v43 = vcombine.high %v2147_v48, %v2322_v12 }
  0xda   :  { %v270_v24 = vcombine.low %v2149_v49, %v2327_v7  ;;  %v271_v48 = vcombine.high %v2149_v49, %v2327_v7 }
  0xdb   :  { %v2456_v49 = vrot.slane %v406_v30, %v2169_v2  ;;  %v2459_v7 = vrot.slane %v407_v43, %v2169_v2 }
  0xdc   :  { %v2361_v33 = vpop.permute.xlu1 %196  ;;  %v278_v58 = vrot.slane %v270_v24, %v2169_v2  ;;  %v285_v0 = vrot.slane %v271_v48, %v2169_v2 }
  0xdd   :  { %v679_v47 = vcombine.high %v2151_v50, %v2361_v33  ;;  %v2369_v4 = vpop.permute.xlu0 %194 }
  0xde   :  { %v542_v25 = vcombine.low %v2153_v51, %v2369_v4  ;;  %v543_v59 = vcombine.high %v2153_v51, %v2369_v4 }
  0xdf   :  { %v2474_v54 = vrot.slane %v679_v47, %v2169_v2 }
  0xe0   :  { %v201_v45 = vpop.permute.xlu1 %200 }
  0xe1   :  { %v951_v39 = vcombine.high %v2155_v55, %v201_v45  ;;  %v199_v37 = vpop.permute.xlu0 %198  ;;  %v950_v57 = vcombine.low %v2155_v55, %v201_v45 }
  0xe2   :  { %v815_v42 = vcombine.high %v2157_v56, %v199_v37  ;;  %v814_v32 = vcombine.low %v2157_v56, %v199_v37  ;;  %v2477_v56 = vrot.slane %v542_v25, %v2169_v2 }
  0xe3   :  { %v2486_v37 = vrot.slane %v951_v39, %v2169_v2 }
  0xe4   :  { %v205_v60 = vpop.permute.xlu1 %204  ;;  %v2499_v48 = vrot.slane %v815_v42, %v2169_v2 }
  0xe5   :  { %v1223_v22 = vcombine.high %v2162_v61, %v205_v60  ;;  %v203_v1 = vpop.permute.xlu0 %202  ;;  %v1222_v51 = vcombine.low %v2162_v61, %v205_v60  ;;  %v2480_v61 = vrot.slane %v543_v59, %v2169_v2 }
  0xe6   :  { %v1087_v12 = vcombine.high %v2165_v63, %v203_v1  ;;  %v1086_v30 = vcombine.low %v2165_v63, %v203_v1  ;;  %v2496_v1 = vrot.slane %v814_v32, %v2169_v2 }
  0xe7   :  { %v2502_v25 = vrot.slane %v1222_v51, %v2169_v2 }
  0xe8   :  { %v217_v31 = vpop.permute.xlu1 %216 }
  0xe9   :  { %v422_v55 = vcombine.low %v2174_v8, %v217_v31  ;;  %v423_v4 = vcombine.high %v2174_v8, %v217_v31  ;;  %v215_v45 = vpop.permute.xlu0 %214  ;;  %v2483_v8 = vrot.slane %v950_v57, %v2169_v2  ;;  %v2508_v57 = vrot.slane %v1223_v22, %v2169_v2 }
  0xea   :  { %v286_v43 = vcombine.low %v2180_v13, %v215_v45  ;;  %v287_v24 = vcombine.high %v2180_v13, %v215_v45  ;;  %v2511_v31 = vrot.slane %v1086_v30, %v2169_v2 }
  0xeb   :  { %v2489_v63 = vrot.slane %v422_v55, %v2169_v2  ;;  %v2505_v39 = vrot.slane %v423_v4, %v2169_v2  ;;  %3286 = vst [vmem:[#allocation23_spill] sm:$0xff] %v2508_v57  ;;  %v2514_v55 = vrot.slane %v1087_v12, %v2169_v2 }
  0xec   :  { %v294_v13 = vrot.slane %v286_v43, %v2169_v2  ;;  %v301_v47 = vrot.slane %v287_v24, %v2169_v2  ;;  %v2493_v60 = vpop.permute.xlu1 %220 }
  0xed   :  { %v219_v59 = vpop.permute.xlu0 %218  ;;  %v695_v51 = vcombine.high %v2209_v35, %v2493_v60  ;;  %v470_v43 = vcombine.low %v2456_v49, %v2489_v63 }
  0xee   :  { %v334_v32 = vcombine.low %v278_v58, %v294_v13  ;;  %v335_v42 = vcombine.high %v278_v58, %v294_v13  ;;  %v350_v45 = vcombine.low %v285_v0, %v301_v47  ;;  %v559_v4 = vcombine.high %v2220_v36, %v219_v59 }
  0xef   :  { %v351_v30 = vcombine.high %v285_v0, %v301_v47  ;;  %v558_v24 = vcombine.low %v2220_v36, %v219_v59  ;;  %v2527_v58 = vrot.slane %v695_v51, %v2169_v2 }
  0xf0   :  { %v225_v12 = vpop.permute.xlu1 %224  ;;  %v2530_v13 = vrot.slane %v559_v4, %v2169_v2  ;;  %v342_v19 = vrot.slane %v334_v32, %v2183_v11  ;;  %v2542_v51 = vrot.slane %v350_v45, %v2183_v11  ;;  %v2545_v4 = vrot.slane %v335_v42, %v2183_v11 }
  0xf1   :  { %v223_v27 = vpop.permute.xlu0 %222  ;;  %v966_v44 = vcombine.low %v2248_v5, %v225_v12  ;;  %v967_v22 = vcombine.high %v2248_v5, %v225_v12  ;;  %v2548_v32 = vrot.slane %v558_v24, %v2169_v2  ;;  %v2555_v12 = vrot.slane %v351_v30, %v2183_v11 }
  0xf2   :  { %v830_v0 = vcombine.low %v2261_v15, %v223_v27  ;;  %v831_v36 = vcombine.high %v2261_v15, %v223_v27  ;;  %v367_v5 = vcombine.high %v2301_v9, %v342_v19  ;;  %v366_v30 = vcombine.low %v2301_v9, %v342_v19 }
  0xf3   :  { %v2558_v59 = vrot.slane %v966_v44, %v2169_v2  ;;  %v2561_v45 = vrot.slane %v967_v22, %v2169_v2  ;;  %v370_v9 = vcombine.low %v2311_v20, %v2542_v51  ;;  %v606_v19 = vcombine.low %v2477_v56, %v2548_v32 }
  0xf4   :  { %v229_v27 = vpop.permute.xlu1 %228  ;;  %v2564_v42 = vrot.slane %v830_v0, %v2169_v2  ;;  %v2567_v24 = vrot.slane %v831_v36, %v2169_v2  ;;  %v1330_v36 = vsel %vm1326_vm0, %v367_v5, -inf  ;;  %v1327_v44 = vsel %vm1326_vm0, %v366_v30, -inf }
  0xf5   :  { %v1238_v47 = vcombine.low %v2283_v34, %v229_v27  ;;  %v1239_v15 = vcombine.high %v2283_v34, %v229_v27  ;;  %v227_v38 = vpop.permute.xlu0 %226  ;;  %1331 = vmax.xlane.f32.xlu1 %v1330_v36  ;;  %1328 = vmax.xlane.f32.xlu0 %v1327_v44  ;;  %v487_v44 = vcombine.high %v2459_v7, %v2505_v39  ;;  %v1339_v5 = vsel %vm1326_vm0, %v370_v9, -inf }
  0xf6   :  { %v1102_v34 = vcombine.low %v2292_v16, %v227_v38  ;;  %v1103_v27 = vcombine.high %v2292_v16, %v227_v38  ;;  %v368_v36 = vcombine.low %v2330_v18, %v2545_v4  ;;  %v372_v30 = vcombine.low %v2333_v26, %v2555_v12 }
  0xf7   :  { %v2590_v22 = vrot.slane %v1238_v47, %v2169_v2  ;;  %v2593_v0 = vrot.slane %v1239_v15, %v2169_v2  ;;  %v478_v15 = vrot.slane %v470_v43, %v2183_v11  ;;  %v369_v57 = vcombine.high %v2330_v18, %v2545_v4 }
  0xf8   :  { %v2612_v16 = vrot.slane %v1102_v34, %v2169_v2  ;;  %v2615_v38 = vrot.slane %v1103_v27, %v2169_v2  ;;  %v1333_v9 = vsel %vm1326_vm0, %v368_v36, -inf  ;;  %v3288_v43 = vcombine.low %v2251_v23, %v2325_v40 }
  0xf9   :  { %3287 = vst [vmem:[#allocation24_spill] sm:$0xff] %v2593_v0  ;;  %1340 = vmax.xlane.f32.xlu1 %v1339_v5  ;;  %v3289_v27 = vcombine.low %v2272_v10, %v2359_v14  ;;  %v678_v5 = vcombine.low %v2151_v50, %v2361_v33  ;;  %v694_v36 = vcombine.low %v2209_v35, %v2493_v60 }
  0xfa   :  { %v2640_v34 = vrot.slane %v3288_v43, %v2183_v11  ;;  %1334 = vmax.xlane.f32.xlu0 %v1333_v9  ;;  %v3290_v18 = vcombine.low %v2212_v52, %v2275_v21  ;;  %v3292_v43 = vcombine.low %v2240_v62, %v2316_v29  ;;  %v502_v50 = vcombine.low %v2338_v46, %v478_v15 }
  0xfb   :  { %v2646_v47 = vrot.slane %v3289_v27, %v2183_v11  ;;  %v1345_v27 = vsel %vm1326_vm0, %v372_v30, -inf  ;;  %v3294_v35 = vcombine.high %v2456_v49, %v2489_v63  ;;  %v3295_v60 = vcombine.low %v2459_v7, %v2505_v39  ;;  %v3296_v30 = vld [vmem:[#allocation11_spill] sm:$0xff] }
  0xfc   :  { %v2656_v4 = vrot.slane %v3290_v18, %v2183_v11  ;;  %v2662_v0 = vrot.slane %v3292_v43, %v2183_v11  ;;  %v501_v18 = vrot.slane %v487_v44, %v2183_v11  ;;  %v614_v43 = vrot.slane %v606_v19, %v2183_v11 }
  0xfd   :  { %v485_v33 = vrot.slane %v3294_v35, %v2183_v11  ;;  %v494_v9 = vrot.slane %v3295_v60, %v2183_v11  ;;  %1346 = vmax.xlane.f32.xlu1 %v1345_v27  ;;  %v3298_v49 = vcombine.high %v2251_v23, %v2325_v40  ;;  %v607_v7 = vcombine.high %v2477_v56, %v2548_v32 }
  0xfe   :  { %3291 = vst [vmem:[#allocation25_spill] sm:$0xff] %v2656_v4  ;;  %3293 = vst [vmem:[#allocation26_spill] sm:$0xff] %v2662_v0  ;;  %v3297_v0 = vcombine.low %v2257_v6, %v3296_v30  ;;  %v1336_v39 = vsel %vm1326_vm0, %v369_v57, -inf  ;;  %v371_v19 = vcombine.high %v2311_v20, %v2542_v51  ;;  %v3299_v44 = vcombine.high %v2272_v10, %v2359_v14  ;;  %v3301_v51 = vld [vmem:[#allocation10_spill] sm:$0xff]  ;;  %v3302_v14 = vld [vmem:[#allocation12_spill] sm:$0xff] }
  0xff   :  { %v2686_v63 = vrot.slane %v3298_v49, %v2183_v11  ;;  %v686_v27 = vrot.slane %v678_v5, %v2169_v2  ;;  %v702_v23 = vrot.slane %v694_v36, %v2169_v2  ;;  %1337 = vmax.xlane.f32.xlu0 %v1336_v39  ;;  %v373_v40 = vcombine.high %v2333_v26, %v2555_v12  ;;  %v3303_v2 = vld [vmem:[#allocation13_spill] sm:$0xff] }
 0x100   :  { %v2680_v4 = vrot.slane %v3297_v0, %v2183_v11  ;;  %v2697_v0 = vrot.slane %v3299_v44, %v2183_v11  ;;  %v3300_v56 = vcombine.high %v2212_v52, %v2275_v21  ;;  %v1351_v20 = vsel %vm1326_vm0, %v502_v50, -inf }
 0x101   :  { %v504_v10 = vcombine.low %v3301_v51, %v485_v33  ;;  %v506_v32 = vcombine.low %v3302_v14, %v494_v9  ;;  %v503_v5 = vcombine.high %v2338_v46, %v478_v15  ;;  %1352 = vmax.xlane.f32.xlu1 %v1351_v20  ;;  %v508_v36 = vcombine.low %v3303_v2, %v501_v18 }
 0x102   :  { %v2707_v57 = vrot.slane %v3300_v56, %v2183_v11  ;;  %v505_v35 = vcombine.high %v3301_v51, %v485_v33  ;;  %v507_v26 = vcombine.high %v3302_v14, %v494_v9  ;;  %v638_v12 = vcombine.low %v2401_v41, %v614_v43 }
 0x103   :  { %v1342_v52 = vsel %vm1326_vm0, %v371_v19, -inf  ;;  %v2719_v21 = vrot.slane %v607_v7, %v2183_v11  ;;  %v3304_v50 = vcombine.high %v2240_v62, %v2316_v29  ;;  %v3305_v46 = vcombine.high %v2257_v6, %v3296_v30 }
 0x104   :  { %v742_v33 = vcombine.low %v686_v27, %v702_v23  ;;  %v743_v9 = vcombine.high %v686_v27, %v702_v23  ;;  %1343 = vmax.xlane.f32.xlu0 %v1342_v52  ;;  %v1348_v49 = vsel %vm1326_vm0, %v373_v40, -inf  ;;  %v3306_v7 = vcombine.low %v2480_v61, %v2530_v13 }
 0x105   :  { %v2725_v60 = vrot.slane %v3304_v50, %v2183_v11  ;;  %v2731_v15 = vrot.slane %v3305_v46, %v2183_v11  ;;  %v1357_v62 = vsel %vm1326_vm0, %v504_v10, -inf  ;;  %v1363_v29 = vsel %vm1326_vm0, %v506_v32, -inf  ;;  %v3313_v46 = vld [vmem:[#allocation16_spill] sm:$0xff] }
 0x106   :  { %v2738_v39 = vrot.slane %v3306_v7, %v2183_v11  ;;  %v1354_v19 = vsel %vm1326_vm0, %v503_v5, -inf  ;;  %v509_v6 = vcombine.high %v3303_v2, %v501_v18  ;;  %1358 = vmax.xlane.f32.xlu1 %v1357_v62  ;;  %v1369_v30 = vsel %vm1326_vm0, %v508_v36, -inf  ;;  %v3314_v62 = vld [vmem:[#allocation15_spill] sm:$0xff]  ;;  %v3320_v2 = vld [vmem:[#allocation22_spill] sm:$0xff] }
 0x107   :  { %v1360_v44 = vsel %vm1326_vm0, %v505_v35, -inf  ;;  %v1366_v27 = vsel %vm1326_vm0, %v507_v26, -inf  ;;  %v1375_v23 = vsel %vm1326_vm0, %v638_v12, -inf  ;;  %v640_v40 = vcombine.low %v2404_v53, %v2719_v21 }
 0x108   :  { %v639_v56 = vcombine.high %v2401_v41, %v614_v43  ;;  %v3307_v20 = vcombine.high %v2480_v61, %v2530_v13  ;;  %v3308_v18 = vcombine.low %v2483_v8, %v2558_v59  ;;  %1349 = vmax.xlane.f32.xlu0 %v1348_v49  ;;  %v642_v14 = vcombine.low %v2407_v28, %v2738_v39 }
 0x109   :  { %v2766_v32 = vrot.slane %v742_v33, %v2183_v11  ;;  %v3309_v41 = vcombine.low %v2502_v25, %v2590_v22  ;;  %v3310_v13 = vcombine.high %v2496_v1, %v2564_v42  ;;  %v2779_v5 = vsel %vm1326_vm0, %v509_v6, -inf }
 0x10a   :  { %v2755_v51 = vrot.slane %v3307_v20, %v2183_v11  ;;  %v2761_v10 = vrot.slane %v3308_v18, %v2183_v11  ;;  %v3311_v35 = vcombine.high %v2511_v31, %v2612_v16  ;;  %1364 = vmax.xlane.f32.xlu1 %v1363_v29  ;;  %v3312_v52 = vcombine.low %v2496_v1, %v2564_v42  ;;  %v3315_v20 = vld [vmem:[#allocation21_spill] sm:$0xff] }
 0x10b   :  { %v2772_v61 = vrot.slane %v3309_v41, %v2183_v11  ;;  %v893_v43 = vrot.slane %v3310_v13, %v2183_v11  ;;  %v2801_v7 = vsel %vm1326_vm0, %v639_v56, -inf  ;;  %v1381_v1 = vsel %vm1326_vm0, %v640_v40, -inf  ;;  %v3316_v41 = vld [vmem:[#allocation17_spill] sm:$0xff] }
 0x10c   :  { %v1165_v26 = vrot.slane %v3311_v35, %v2183_v11  ;;  %v2795_v50 = vrot.slane %v3312_v52, %v2183_v11  ;;  %1355 = vmax.xlane.f32.xlu0 %v1354_v19  ;;  %v1387_v42 = vsel %vm1326_vm0, %v642_v14, -inf  ;;  %v757_v33 = vrot.slane %v743_v9, %v2183_v11 }
 0x10d   :  { %v912_v49 = vcombine.low %v2436_v17, %v893_v43  ;;  %v1318_v6 = vcombine.low %v3313_v46, %v2772_v61  ;;  %v3317_v19 = vcombine.high %v2483_v8, %v2558_v59  ;;  %v3318_v14 = vcombine.high %v2502_v25, %v2590_v22  ;;  %v3321_v59 = vld [vmem:[#allocation19_spill] sm:$0xff]  ;;  %v3322_v25 = vld [vmem:[#allocation20_spill] sm:$0xff] }
 0x10e   :  { %v1184_v18 = vcombine.low %v3315_v20, %v1165_v26  ;;  %1370 = vmax.xlane.f32.xlu1 %v1369_v30  ;;  %v913_v36 = vcombine.high %v2436_v17, %v893_v43  ;;  %v1185_v9 = vcombine.high %v3315_v20, %v1165_v26  ;;  %v776_v13 = vcombine.low %v3320_v2, %v757_v33 }
 0x10f   :  { %v2813_v35 = vsel %vm1326_vm0, %v912_v49, -inf  ;;  %v2816_v56 = vsel %vm1326_vm0, %v1318_v6, -inf  ;;  %v1029_v40 = vrot.slane %v3317_v19, %v2183_v11  ;;  %v1301_v49 = vrot.slane %v3318_v14, %v2183_v11 }
 0x110   :  { %v2819_v52 = vsel %vm1326_vm0, %v1184_v18, -inf  ;;  %v3319_v6 = vcombine.low %v2499_v48, %v2567_v24  ;;  %v777_v8 = vcombine.high %v3320_v2, %v757_v33  ;;  %1361 = vmax.xlane.f32.xlu0 %v1360_v44  ;;  %v2843_v43 = vsel %vm1326_vm0, %v913_v36, -inf }
 0x111   :  { %v1048_v30 = vcombine.low %v3321_v59, %v1029_v40  ;;  %v1049_v19 = vcombine.high %v3321_v59, %v1029_v40  ;;  %v1320_v22 = vcombine.low %v3322_v25, %v1301_v49  ;;  %v1321_v17 = vcombine.high %v3322_v25, %v1301_v49  ;;  %v3329_v25 = vld [vmem:[#allocation24_spill] sm:$0xff] }
 0x112   :  { %v902_v18 = vrot.slane %v3319_v6, %v2183_v11  ;;  %v2847_v26 = vsel %vm1326_vm0, %v776_v13, -inf  ;;  %v2850_v20 = vsel %vm1326_vm0, %v777_v8, -inf  ;;  %1376 = vmax.xlane.f32.xlu1 %v1375_v23  ;;  %v2868_v13 = vsel %vm1326_vm0, %v1185_v9, -inf }
 0x113   :  { %v2853_v2 = vsel %vm1326_vm0, %v1048_v30, -inf  ;;  %v2856_v44 = vsel %vm1326_vm0, %v1049_v19, -inf  ;;  %v2859_v33 = vsel %vm1326_vm0, %v1320_v22, -inf  ;;  %v2862_v36 = vsel %vm1326_vm0, %v1321_v17, -inf  ;;  %3324 = vst [vmem:[#allocation10_spill] sm:$0xff] %v2868_v13  ;;  %v3328_v19 = vld [vmem:[#allocation23_spill] sm:$0xff] }
 0x114   :  { %v914_v14 = vcombine.low %v2640_v34, %v902_v18  ;;  %v3325_v49 = vcombine.low %v2514_v55, %v2615_v38  ;;  %v3326_v23 = vcombine.low %v2474_v54, %v2527_v58  ;;  %v3327_v59 = vcombine.low %v2486_v37, %v2561_v45  ;;  %1367 = vmax.xlane.f32.xlu0 %v1366_v27  ;;  %v3334_v27 = vld [vmem:[#allocation25_spill] sm:$0xff] }
 0x115   :  { %v3330_v9 = vcombine.low %v3328_v19, %v3329_v25  ;;  %v915_v17 = vcombine.high %v2640_v34, %v902_v18  ;;  %v3335_v18 = vld [vmem:[#allocation26_spill] sm:$0xff] }
 0x116   :  { %v2865_v40 = vsel %vm1326_vm0, %v914_v14, -inf  ;;  %v1174_v6 = vrot.slane %v3325_v49, %v2183_v11  ;;  %v766_v8 = vrot.slane %v3326_v23, %v2183_v11  ;;  %v1038_v30 = vrot.slane %v3327_v59, %v2183_v11  ;;  %1382 = vmax.xlane.f32.xlu1 %v1381_v1 }
 0x117   :  { %3323 = vst [vmem:[#allocation11_spill] sm:$0xff] %v2865_v40  ;;  %v1310_v22 = vrot.slane %v3330_v9, %v2183_v11  ;;  %v3331_v14 = vcombine.high %v2499_v48, %v2567_v24  ;;  %v3332_v23 = vcombine.high %v2514_v55, %v2615_v38  ;;  %v3333_v59 = vcombine.high %v2474_v54, %v2527_v58 }
 0x118   :  { %v1186_v9 = vcombine.low %v2646_v47, %v1174_v6  ;;  %v778_v13 = vcombine.low %v3334_v27, %v766_v8  ;;  %v779_v34 = vcombine.high %v3334_v27, %v766_v8  ;;  %v1050_v40 = vcombine.low %v3335_v18, %v1038_v30  ;;  %1373 = vmax.xlane.f32.xlu0 %v2779_v5 }
 0x119   :  { %v909_v49 = vrot.slane %v3331_v14, %v2183_v11  ;;  %v1181_v12 = vrot.slane %v3332_v23, %v2183_v11  ;;  %v773_v29 = vrot.slane %v3333_v59, %v2183_v11  ;;  %v1051_v48 = vcombine.high %v3335_v18, %v1038_v30 }
 0x11a   :  { %v1322_v24 = vcombine.low %v2680_v4, %v1310_v22  ;;  %v1323_v55 = vcombine.high %v2680_v4, %v1310_v22  ;;  %v2907_v38 = vsel %vm1326_vm0, %v915_v17, -inf  ;;  %v2910_v54 = vsel %vm1326_vm0, %v1186_v9, -inf  ;;  %1388 = vmax.xlane.f32.xlu1 %v1387_v42 }
 0x11b   :  { %v2913_v58 = vsel %vm1326_vm0, %v778_v13, -inf  ;;  %v2916_v8 = vsel %vm1326_vm0, %v779_v34, -inf  ;;  %v2919_v1 = vsel %vm1326_vm0, %v1050_v40, -inf  ;;  %v2923_v30 = vsel %vm1326_vm0, %v1051_v48, -inf }
 0x11c   :  { %v2926_v4 = vsel %vm1326_vm0, %v1322_v24, -inf  ;;  %v2929_v22 = vsel %vm1326_vm0, %v1323_v55, -inf  ;;  %v916_v13 = vcombine.low %v2686_v63, %v909_v49  ;;  %v1187_v17 = vcombine.high %v2646_v47, %v1174_v6  ;;  %1379 = vmax.xlane.f32.xlu0 %v2801_v7 }
 0x11d   :  { %v1188_v14 = vcombine.low %v2697_v0, %v1181_v12  ;;  %v780_v40 = vcombine.low %v2707_v57, %v773_v29  ;;  %v645_v5 = vcombine.high %v3314_v62, %v2755_v51  ;;  %v3336_v59 = vcombine.high %v2486_v37, %v2561_v45 }
 0x11e   :  { %v2938_v23 = vsel %vm1326_vm0, %v916_v13, -inf  ;;  %v917_v27 = vcombine.high %v2686_v63, %v909_v49  ;;  %v3337_v47 = vcombine.high %v3328_v19, %v3329_v25  ;;  %v2950_v34 = vsel %vm1326_vm0, %v1187_v17, -inf }
 0x11f   :  { %v1045_v9 = vrot.slane %v3336_v59, %v2183_v11  ;;  %v2953_v42 = vsel %vm1326_vm0, %v1188_v14, -inf  ;;  %v2956_v18 = vsel %vm1326_vm0, %v780_v40, -inf  ;;  %v2959_v48 = vsel %vm1326_vm0, %v645_v5, -inf  ;;  %v3342_v40 = vld [vmem:[#allocation14_spill] sm:$0xff]  ;;  %v3343_v5 = vld [vmem:[#allocation9_spill] sm:$0xff] }
 0x120   :  { %v1317_v6 = vrot.slane %v3337_v47, %v2183_v11  ;;  %v2964_v45 = vsel %vm1326_vm0, %v917_v27, -inf  ;;  %v1189_v19 = vcombine.high %v2697_v0, %v1181_v12  ;;  %v3338_v25 = vcombine.low %v3314_v62, %v2755_v51  ;;  %v3341_v62 = vld [vmem:[#allocation18_spill] sm:$0xff] }
 0x121   :  { %v1052_v37 = vcombine.low %v2725_v60, %v1045_v9  ;;  %v781_v24 = vcombine.high %v2707_v57, %v773_v29  ;;  %v1053_v55 = vcombine.high %v2725_v60, %v1045_v9  ;;  %v643_v13 = vcombine.high %v2407_v28, %v2738_v39 }
 0x122   :  { %v1324_v63 = vcombine.low %v2731_v15, %v1317_v6  ;;  %v1393_v49 = vsel %vm1326_vm0, %v3338_v25, -inf  ;;  %v1325_v7 = vcombine.high %v2731_v15, %v1317_v6  ;;  %v1492_v0 = vsel %vm1326_vm0, %v1189_v19, -inf }
 0x123   :  { %1394 = vmax.xlane.f32.xlu1 %v1393_v49  ;;  %v1465_v17 = vsel %vm1326_vm0, %v1052_v37, -inf  ;;  %v3339_v51 = vcombine.high %v2404_v53, %v2719_v21  ;;  %v1420_v57 = vsel %vm1326_vm0, %v781_v24, -inf  ;;  %v1468_v60 = vsel %vm1326_vm0, %v1053_v55, -inf }
 0x124   :  { %v1513_v14 = vsel %vm1326_vm0, %v1324_v63, -inf  ;;  %v1516_v15 = vsel %vm1326_vm0, %v1325_v7, -inf  ;;  %v3340_v28 = vcombine.high %v3316_v41, %v2766_v32  ;;  %v911_v29 = vcombine.high %v3341_v62, %v2795_v50 }
 0x125   :  { %v1384_v12 = vsel %vm1326_vm0, %v3339_v51, -inf  ;;  %v1390_v53 = vsel %vm1326_vm0, %v643_v13, -inf  ;;  %v774_v21 = vcombine.low %v3316_v41, %v2766_v32  ;;  %v1118_v59 = vcombine.low %v3343_v5, %v3342_v40 }
 0x126   :  { %1385 = vmax.xlane.f32.xlu0 %v1384_v12  ;;  %v1402_v39 = vsel %vm1326_vm0, %v3340_v28, -inf  ;;  %v1426_v9 = vsel %vm1326_vm0, %v911_v29, -inf  ;;  %v3344_v27 = vcombine.low %v2511_v31, %v2612_v16  ;;  %v910_v37 = vcombine.low %v3341_v62, %v2795_v50 }
 0x127   :  { %1403 = vmax.xlane.f32.xlu1 %v1402_v39  ;;  %v1399_v6 = vsel %vm1326_vm0, %v774_v21, -inf  ;;  %v1126_v63 = vrot.slane %v1118_v59, %v2183_v11  ;;  %v3345_v32 = vcombine.high %v2413_v3, %v2761_v10  ;;  %v3346_v16 = vcombine.low %v2413_v3, %v2761_v10  ;;  %v3348_v3 = vld [vmem:[#allocation11_spill] sm:$0xff]  ;;  %v3349_v10 = vld [vmem:[#allocation10_spill] sm:$0xff] }
 0x128   :  { %v1158_v47 = vrot.slane %v3344_v27, %v2183_v11  ;;  %v1423_v25 = vsel %vm1326_vm0, %v910_v37, -inf  ;;  %v3347_v49 = vcombine.high %v3313_v46, %v2772_v61  ;;  %v3350_v61 = vlaneseq }
 0x129   :  { %v1450_v41 = vsel %vm1326_vm0, %v3345_v32, -inf  ;;  %v1447_v50 = vsel %vm1326_vm0, %v3346_v16, -inf }
 0x12a   :  { %1391 = vmax.xlane.f32.xlu0 %v1390_v53  ;;  %v1183_v19 = vcombine.high %v1126_v63, %v1158_v47  ;;  %v1182_v11 = vcombine.low %v1126_v63, %v1158_v47  ;;  %v1498_v24 = vsel %vm1326_vm0, %v3347_v49, -inf  ;;  %v1584_v46 = vand.u32 127, %v3350_v61 }
 0x12b   :  { %1427 = vmax.xlane.f32.xlu1 %v1426_v9 }
 0x12c   :  { %v1474_v31 = vsel %vm1326_vm0, %v1183_v19, -inf  ;;  %v1471_v55 = vsel %vm1326_vm0, %v1182_v11, -inf }
 0x12e   :  { %1400 = vmax.xlane.f32.xlu0 %v1399_v6 }
 0x12f   :  { %1451 = vmax.xlane.f32.xlu1 %v1450_v41 }
 0x132   :  { %1424 = vmax.xlane.f32.xlu0 %v1423_v25 }
 0x133   :  { %1475 = vmax.xlane.f32.xlu1 %v1474_v31 }
 0x136   :  { %1448 = vmax.xlane.f32.xlu0 %v1447_v50 }
 0x137   :  { %1499 = vmax.xlane.f32.xlu1 %v1498_v24 }
 0x13a   :  { %1472 = vmax.xlane.f32.xlu0 %v1471_v55 }
 0x13b   :  { %1430 = vmax.xlane.f32.xlu1 %v2813_v35 }
 0x13e   :  { %1496 = vmax.xlane.f32.xlu0 %v2816_v56 }
 0x13f   :  { %1478 = vmax.xlane.f32.xlu1 %v2819_v52  ;;  %v3351_v52 = vld [vmem:[#allocation8_spill] sm:$0xff] }
 0x142   :  { %1406 = vmax.xlane.f32.xlu0 %v2847_v26 }
 0x143   :  { %1409 = vmax.xlane.f32.xlu1 %v2850_v20 }
 0x146   :  { %1454 = vmax.xlane.f32.xlu0 %v2853_v2 }
 0x147   :  { %1457 = vmax.xlane.f32.xlu1 %v2856_v44 }
 0x14a   :  { %1502 = vmax.xlane.f32.xlu0 %v2859_v33 }
 0x14b   :  { %1505 = vmax.xlane.f32.xlu1 %v2862_v36 }
 0x14e   :  { %1433 = vmax.xlane.f32.xlu0 %v2843_v43  ;;  %v3050_v43 = vsub.s32 %v1584_v46, %v3351_v52 }
 0x14f   :  { %1436 = vmax.xlane.f32.xlu1 %v3348_v3 }
 0x152   :  { %1481 = vmax.xlane.f32.xlu0 %v3349_v10 }
 0x153   :  { %1484 = vmax.xlane.f32.xlu1 %v2910_v54 }
 0x156   :  { %1412 = vmax.xlane.f32.xlu0 %v2913_v58 }
 0x157   :  { %1415 = vmax.xlane.f32.xlu1 %v2916_v8 }
 0x15a   :  { %1460 = vmax.xlane.f32.xlu0 %v2919_v1 }
 0x15b   :  { %1463 = vmax.xlane.f32.xlu1 %v2923_v30 }
 0x15e   :  { %1508 = vmax.xlane.f32.xlu0 %v2926_v4 }
 0x15f   :  { %1511 = vmax.xlane.f32.xlu1 %v2929_v22 }
 0x162   :  { %1439 = vmax.xlane.f32.xlu0 %v2907_v38 }
 0x163   :  { %1442 = vmax.xlane.f32.xlu1 %v2938_v23 }
 0x166   :  { %1487 = vmax.xlane.f32.xlu0 %v2950_v34 }
 0x167   :  { %1490 = vmax.xlane.f32.xlu1 %v2953_v42 }
 0x16a   :  { %1418 = vmax.xlane.f32.xlu0 %v2956_v18 }
 0x16b   :  { %1397 = vmax.xlane.f32.xlu1 %v2959_v48 }
 0x16e   :  { %1466 = vmax.xlane.f32.xlu0 %v1465_v17 }
 0x16f   :  { %1445 = vmax.xlane.f32.xlu1 %v2964_v45 }
 0x172   :  { %1514 = vmax.xlane.f32.xlu0 %v1513_v14 }
 0x173   :  { %1493 = vmax.xlane.f32.xlu1 %v1492_v0 }
 0x176   :  { %1421 = vmax.xlane.f32.xlu0 %v1420_v57 }
 0x17a   :  { %1469 = vmax.xlane.f32.xlu0 %v1468_v60 }
 0x17e   :  { %1517 = vmax.xlane.f32.xlu0 %v1516_v15 }
 0x182   :  { %v1332_v35 = vpop.xlane.xlu1 %1331  ;;  %v1329_v56 = vpop.xlane.xlu0 %1328 }
 0x183   :  { %v1592_v2 = vrot.slane %v1332_v35, %v3050_v43  ;;  %v1588_v44 = vrot.slane %v1329_v56, %v3050_v43 }
 0x185   :  { %v1842_v54 = vsel %vm1841_vm1, %v1592_v2, %v1588_v44 }
 0x186   :  { %v1341_v26 = vpop.xlane.xlu1 %1340 }
 0x187   :  { %v1335_v20 = vpop.xlane.xlu0 %1334  ;;  %v1604_v4 = vrot.slane %v1341_v26, %v3050_v43 }
 0x188   :  { %v1596_v33 = vrot.slane %v1335_v20, %v3050_v43 }
 0x18a   :  { %v1347_v36 = vpop.xlane.xlu1 %1346  ;;  %v1844_v8 = vsel %vm1843_vm2, %v1596_v33, %v1842_v54 }
 0x18b   :  { %v1612_v48 = vrot.slane %v1347_v36, %v3050_v43 }
 0x18c   :  { %v1338_v38 = vpop.xlane.xlu0 %1337 }
 0x18d   :  { %v1600_v58 = vrot.slane %v1338_v38, %v3050_v43 }
 0x18e   :  { %v1353_v1 = vpop.xlane.xlu1 %1352 }
 0x18f   :  { %v1846_v30 = vsel %vm1845_vm3, %v1600_v58, %v1844_v8  ;;  %v1620_v51 = vrot.slane %v1353_v1, %v3050_v43 }
 0x190   :  { %v1848_v34 = vsel %vm1847_vm4, %v1604_v4, %v1846_v30 }
 0x191   :  { %v1344_v22 = vpop.xlane.xlu0 %1343 }
 0x192   :  { %v1608_v23 = vrot.slane %v1344_v22, %v3050_v43 }
 0x193   :  { %v1359_v42 = vpop.xlane.xlu1 %1358 }
 0x194   :  { %v1850_v18 = vsel %vm1849_vm5, %v1608_v23, %v1848_v34  ;;  %v1628_v15 = vrot.slane %v1359_v42, %v3050_v43 }
 0x195   :  { %v1350_v45 = vpop.xlane.xlu0 %1349  ;;  %v1852_v13 = vsel %vm1851_vm6, %v1612_v48, %v1850_v18 }
 0x196   :  { %v1616_v7 = vrot.slane %v1350_v45, %v3050_v43 }
 0x197   :  { %v1365_v17 = vpop.xlane.xlu1 %1364 }
 0x198   :  { %v1854_v14 = vsel %vm1853_vm7, %v1616_v7, %v1852_v13  ;;  %v1636_v21 = vrot.slane %v1365_v17, %v3050_v43 }
 0x199   :  { %1913 = vst.msk [vmem:[#allocation5] sm:$0xff] %vm1912_vm8, %v1854_v14  ;;  %v1356_v0 = vpop.xlane.xlu0 %1355 }
 0x19a   :  { %v1624_v12 = vrot.slane %v1356_v0, %v3050_v43 }
 0x19b   :  { %v1371_v57 = vpop.xlane.xlu1 %1370 }
 0x19c   :  { %v1855_v60 = vsel %vm1841_vm1, %v1624_v12, %v1620_v51  ;;  %v1644_v47 = vrot.slane %v1371_v57, %v3050_v43 }
 0x19d   :  { %v1362_v28 = vpop.xlane.xlu0 %1361  ;;  %v1856_v62 = vsel %vm1843_vm2, %v1628_v15, %v1855_v60 }
 0x19e   :  { %v1632_v39 = vrot.slane %v1362_v28, %v3050_v43 }
 0x19f   :  { %v1377_v29 = vpop.xlane.xlu1 %1376 }
 0x1a0   :  { %v1857_v53 = vsel %vm1845_vm3, %v1632_v39, %v1856_v62  ;;  %v1652_v25 = vrot.slane %v1377_v29, %v3050_v43 }
 0x1a1   :  { %v1368_v40 = vpop.xlane.xlu0 %1367  ;;  %v1858_v59 = vsel %vm1847_vm4, %v1636_v21, %v1857_v53 }
 0x1a2   :  { %v1640_v5 = vrot.slane %v1368_v40, %v3050_v43 }
 0x1a3   :  { %v1383_v9 = vpop.xlane.xlu1 %1382 }
 0x1a4   :  { %v1859_v27 = vsel %vm1849_vm5, %v1640_v5, %v1858_v59  ;;  %v1660_v16 = vrot.slane %v1383_v9, %v3050_v43 }
 0x1a5   :  { %v1374_v6 = vpop.xlane.xlu0 %1373  ;;  %v1860_v63 = vsel %vm1851_vm6, %v1644_v47, %v1859_v27 }
 0x1a6   :  { %v1648_v37 = vrot.slane %v1374_v6, %v3050_v43 }
 0x1a7   :  { %v1389_v32 = vpop.xlane.xlu1 %1388 }
 0x1a8   :  { %v1861_v41 = vsel %vm1853_vm7, %v1648_v37, %v1860_v63  ;;  %v1668_v3 = vrot.slane %v1389_v32, %v3050_v43 }
 0x1a9   :  { %1914 = vst.msk [vmem:[#allocation5 + $0x8] sm:$0xff] %vm1912_vm8, %v1861_v41  ;;  %v1380_v19 = vpop.xlane.xlu0 %1379 }
 0x1aa   :  { %v1656_v31 = vrot.slane %v1380_v19, %v3050_v43 }
 0x1ac   :  { %v1862_v11 = vsel %vm1841_vm1, %v1656_v31, %v1652_v25 }
 0x1ad   :  { %v1863_v49 = vsel %vm1843_vm2, %v1660_v16, %v1862_v11 }
 0x1b0   :  { %v1395_v50 = vpop.xlane.xlu1 %1394 }
 0x1b1   :  { %v1676_v52 = vrot.slane %v1395_v50, %v3050_v43 }
 0x1b3   :  { %v1386_v24 = vpop.xlane.xlu0 %1385 }
 0x1b4   :  { %v1664_v55 = vrot.slane %v1386_v24, %v3050_v43  ;;  %v1404_v10 = vpop.xlane.xlu1 %1403 }
 0x1b5   :  { %v1688_v33 = vrot.slane %v1404_v10, %v3050_v43 }
 0x1b6   :  { %v1864_v61 = vsel %vm1845_vm3, %v1664_v55, %v1863_v49 }
 0x1b7   :  { %v1865_v46 = vsel %vm1847_vm4, %v1668_v3, %v1864_v61  ;;  %v1392_v35 = vpop.xlane.xlu0 %1391 }
 0x1b8   :  { %v1672_v56 = vrot.slane %v1392_v35, %v3050_v43  ;;  %v1428_v26 = vpop.xlane.xlu1 %1427 }
 0x1b9   :  { %v1720_v9 = vrot.slane %v1428_v26, %v3050_v43 }
 0x1ba   :  { %v1866_v20 = vsel %vm1849_vm5, %v1672_v56, %v1865_v46 }
 0x1bb   :  { %v1401_v2 = vpop.xlane.xlu0 %1400  ;;  %v1867_v44 = vsel %vm1851_vm6, %v1676_v52, %v1866_v20 }
 0x1bc   :  { %v1684_v36 = vrot.slane %v1401_v2, %v3050_v43  ;;  %v3099_v38 = vpop.xlane.xlu1 %1451 }
 0x1bd   :  { %v1752_v63 = vrot.slane %v3099_v38, %v3050_v43 }
 0x1be   :  { %v3102_v54 = vsel %vm1841_vm1, %v1688_v33, %v1684_v36 }
 0x1bf   :  { %v1425_v58 = vpop.xlane.xlu0 %1424 }
 0x1c0   :  { %v1476_v8 = vpop.xlane.xlu1 %1475  ;;  %v1716_v40 = vrot.slane %v1425_v58, %v3050_v43 }
 0x1c1   :  { %v1784_v25 = vrot.slane %v1476_v8, %v3050_v43 }
 0x1c2   :  { %v1876_v32 = vsel %vm1841_vm1, %v1720_v9, %v1716_v40 }
 0x1c3   :  { %v3104_v1 = vpop.xlane.xlu0 %1448 }
 0x1c4   :  { %v3106_v30 = vpop.xlane.xlu1 %1499  ;;  %v1748_v49 = vrot.slane %v3104_v1, %v3050_v43 }
 0x1c6   :  { %v1883_v8 = vsel %vm1841_vm1, %v1752_v63, %v1748_v49 }
 0x1c7   :  { %v1473_v4 = vpop.xlane.xlu0 %1472 }
 0x1c8   :  { %v1431_v22 = vpop.xlane.xlu1 %1430  ;;  %v1780_v47 = vrot.slane %v1473_v4, %v3050_v43 }
 0x1c9   :  { %v1724_v5 = vrot.slane %v1431_v22, %v3050_v43 }
 0x1ca   :  { %v1890_v10 = vsel %vm1841_vm1, %v1784_v25, %v1780_v47 }
 0x1cb   :  { %v3108_v23 = vpop.xlane.xlu0 %1496  ;;  %v1877_v31 = vsel %vm1843_vm2, %v1724_v5, %v1876_v32 }
 0x1cc   :  { %v1479_v34 = vpop.xlane.xlu1 %1478 }
 0x1cd   :  { %v1788_v16 = vrot.slane %v1479_v34, %v3050_v43 }
 0x1cf   :  { %v1407_v42 = vpop.xlane.xlu0 %1406 }
 0x1d0   :  { %v3110_v18 = vpop.xlane.xlu1 %1409  ;;  %v1692_v61 = vrot.slane %v1407_v42, %v3050_v43 }
 0x1d1   :  { %v1696_v52 = vrot.slane %v3110_v18, %v3050_v43 }
 0x1d2   :  { %v1870_v34 = vsel %vm1843_vm2, %v1692_v61, %v3102_v54  ;;  %v1812_v54 = vrot.slane %v3108_v23, %v3050_v43 }
 0x1d3   :  { %v3112_v48 = vpop.xlane.xlu0 %1454 }
 0x1d4   :  { %v3114_v45 = vpop.xlane.xlu1 %1457  ;;  %v1756_v42 = vrot.slane %v3112_v48, %v3050_v43 }
 0x1d7   :  { %v3116_v7 = vpop.xlane.xlu0 %1502 }
 0x1d8   :  { %v3118_v13 = vpop.xlane.xlu1 %1505  ;;  %v1820_v23 = vrot.slane %v3116_v7, %v3050_v43 }
 0x1d9   :  { %v1824_v47 = vrot.slane %v3118_v13, %v3050_v43 }
 0x1db   :  { %v1434_v17 = vpop.xlane.xlu0 %1433 }
 0x1dc   :  { %v1437_v14 = vpop.xlane.xlu1 %1436  ;;  %v1728_v27 = vrot.slane %v1434_v17, %v3050_v43 }
 0x1dd   :  { %v1732_v6 = vrot.slane %v1437_v14, %v3050_v43 }
 0x1de   :  { %v1878_v24 = vsel %vm1845_vm3, %v1728_v27, %v1877_v31  ;;  %v1816_v27 = vrot.slane %v3106_v30, %v3050_v43 }
 0x1df   :  { %v1482_v0 = vpop.xlane.xlu0 %1481  ;;  %v1879_v46 = vsel %vm1847_vm4, %v1732_v6, %v1878_v24 }
 0x1e0   :  { %v1485_v51 = vpop.xlane.xlu1 %1484  ;;  %v1792_v55 = vrot.slane %v1482_v0, %v3050_v43  ;;  %v1871_v0 = vsel %vm1845_vm3, %v1696_v52, %v1870_v34  ;;  %v1897_v32 = vsel %vm1841_vm1, %v1816_v27, %v1812_v54 }
 0x1e1   :  { %v1796_v35 = vrot.slane %v1485_v51, %v3050_v43  ;;  %v1760_v51 = vrot.slane %v3114_v45, %v3050_v43  ;;  %v1898_v13 = vsel %vm1843_vm2, %v1820_v23, %v1897_v32 }
 0x1e3   :  { %v3120_v12 = vpop.xlane.xlu0 %1412 }
 0x1e4   :  { %v3122_v57 = vpop.xlane.xlu1 %1415  ;;  %v1700_v33 = vrot.slane %v3120_v12, %v3050_v43 }
 0x1e5   :  { %v1704_v4 = vrot.slane %v3122_v57, %v3050_v43 }
 0x1e6   :  { %v1872_v48 = vsel %vm1847_vm4, %v1700_v33, %v1871_v0 }
 0x1e7   :  { %v3124_v60 = vpop.xlane.xlu0 %1460 }
 0x1e8   :  { %v3126_v15 = vpop.xlane.xlu1 %1463 }
 0x1e9   :  { %v1768_v45 = vrot.slane %v3126_v15, %v3050_v43 }
 0x1eb   :  { %v3128_v28 = vpop.xlane.xlu0 %1508 }
 0x1ec   :  { %v3130_v39 = vpop.xlane.xlu1 %1511  ;;  %v1828_v7 = vrot.slane %v3128_v28, %v3050_v43  ;;  %v1899_v28 = vsel %vm1845_vm3, %v1824_v47, %v1898_v13 }
 0x1ed   :  { %v1832_v30 = vrot.slane %v3130_v39, %v3050_v43 }
 0x1ef   :  { %v1440_v62 = vpop.xlane.xlu0 %1439 }
 0x1f0   :  { %v1443_v29 = vpop.xlane.xlu1 %1442  ;;  %v1736_v41 = vrot.slane %v1440_v62, %v3050_v43  ;;  %v1764_v62 = vrot.slane %v3124_v60, %v3050_v43 }
 0x1f1   :  { %v1740_v50 = vrot.slane %v1443_v29, %v3050_v43 }
 0x1f2   :  { %v1880_v26 = vsel %vm1849_vm5, %v1736_v41, %v1879_v46 }
 0x1f3   :  { %v1488_v53 = vpop.xlane.xlu0 %1487  ;;  %v1881_v36 = vsel %vm1851_vm6, %v1740_v50, %v1880_v26  ;;  %v1900_v50 = vsel %vm1847_vm4, %v1828_v7, %v1899_v28 }
 0x1f4   :  { %v1491_v21 = vpop.xlane.xlu1 %1490  ;;  %v1800_v20 = vrot.slane %v1488_v53, %v3050_v43  ;;  %v1901_v39 = vsel %vm1849_vm5, %v1832_v30, %v1900_v50 }
 0x1f5   :  { %v1804_v38 = vrot.slane %v1491_v21, %v3050_v43  ;;  %v1873_v21 = vsel %vm1849_vm5, %v1704_v4, %v1872_v48 }
 0x1f7   :  { %v1419_v59 = vpop.xlane.xlu0 %1418 }
 0x1f8   :  { %v1398_v37 = vpop.xlane.xlu1 %1397  ;;  %v1708_v17 = vrot.slane %v1419_v59, %v3050_v43  ;;  %v1884_v59 = vsel %vm1843_vm2, %v1756_v42, %v1883_v8 }
 0x1f9   :  { %v1680_v19 = vrot.slane %v1398_v37, %v3050_v43  ;;  %v1885_v15 = vsel %vm1845_vm3, %v1760_v51, %v1884_v59 }
 0x1fa   :  { %v1874_v9 = vsel %vm1851_vm6, %v1708_v17, %v1873_v21  ;;  %v1886_v37 = vsel %vm1847_vm4, %v1764_v62, %v1885_v15 }
 0x1fb   :  { %v3147_v11 = vpop.xlane.xlu0 %1466  ;;  %v1868_v3 = vsel %vm1853_vm7, %v1680_v19, %v1867_v44  ;;  %v1891_v44 = vsel %vm1843_vm2, %v1788_v16, %v1890_v10  ;;  %v1887_v41 = vsel %vm1849_vm5, %v1768_v45, %v1886_v37 }
 0x1fc   :  { %1915 = vst.msk [vmem:[#allocation5 + $0x10] sm:$0xff] %vm1912_vm8, %v1868_v3  ;;  %v1446_v56 = vpop.xlane.xlu1 %1445  ;;  %v1892_v1 = vsel %vm1845_vm3, %v1792_v55, %v1891_v44  ;;  %v1772_v60 = vrot.slane %v3147_v11, %v3050_v43 }
 0x1fd   :  { %v1744_v2 = vrot.slane %v1446_v56, %v3050_v43  ;;  %v1893_v18 = vsel %vm1847_vm4, %v1796_v35, %v1892_v1 }
 0x1fe   :  { %v1894_v12 = vsel %vm1849_vm5, %v1800_v20, %v1893_v18  ;;  %v1888_v25 = vsel %vm1851_vm6, %v1772_v60, %v1887_v41 }
 0x1ff   :  { %v1515_v58 = vpop.xlane.xlu0 %1514  ;;  %v1882_v22 = vsel %vm1853_vm7, %v1744_v2, %v1881_v36  ;;  %v1895_v29 = vsel %vm1851_vm6, %v1804_v38, %v1894_v12 }
 0x200   :  { %1917 = vst.msk [vmem:[#allocation5 + $0x20] sm:$0xff] %vm1912_vm8, %v1882_v22  ;;  %v1494_v14 = vpop.xlane.xlu1 %1493  ;;  %v1836_v31 = vrot.slane %v1515_v58, %v3050_v43 }
 0x201   :  { %v1808_v57 = vrot.slane %v1494_v14, %v3050_v43 }
 0x202   :  { %v1902_v24 = vsel %vm1851_vm6, %v1836_v31, %v1901_v39 }
 0x203   :  { %v1422_v53 = vpop.xlane.xlu0 %1421  ;;  %v1896_v40 = vsel %vm1853_vm7, %v1808_v57, %v1895_v29 }
 0x204   :  { %v1712_v5 = vrot.slane %v1422_v53, %v3050_v43  ;;  %1919 = vst.msk [vmem:[#allocation5 + $0x30] sm:$0xff] %vm1912_vm8, %v1896_v40 }
 0x206   :  { %v1875_v6 = vsel %vm1853_vm7, %v1712_v5, %v1874_v9 }
 0x207   :  { %1916 = vst.msk [vmem:[#allocation5 + $0x18] sm:$0xff] %vm1912_vm8, %v1875_v6  ;;  %v1470_v63 = vpop.xlane.xlu0 %1469 }
 0x208   :  { %v1776_v19 = vrot.slane %v1470_v63, %v3050_v43 }
 0x20a   :  { %v1889_v16 = vsel %vm1853_vm7, %v1776_v19, %v1888_v25 }
 0x20b   :  { %1918 = vst.msk [vmem:[#allocation5 + $0x28] sm:$0xff] %vm1912_vm8, %v1889_v16  ;;  %v1518_v11 = vpop.xlane.xlu0 %1517 }
 0x20c   :  { %v1840_v49 = vrot.slane %v1518_v11, %v3050_v43 }
 0x20e   :  { %v1903_v55 = vsel %vm1853_vm7, %v1840_v49, %v1902_v24 }
 0x20f   :  { %1920 = vst.msk [vmem:[#allocation5 + $0x38] sm:$0xff] %vm1912_vm8, %v1903_v55 }
 0x210   :  { %1984 = shalt.err (!%p1981_p12)
}
 0x211   :  { %s1985_s2 = scalar_lea.hbm %s3247_s1, 1024 }
 0x212   :  { %p1986_p13 = scmp.ne.s32.totalorder %s3247_s1, %s1985_s2  ;;  %p1989_p0 = scmp.lt.u32.totalorder %s1985_s2, %s3247_s1 }
 0x214   :  { %p1991_p1 = pnand %p1989_p0, %p1986_p13 }
 0x216   :  { %1994 = shalt.err (!%p1991_p1)
}
 0x217   :  { %1932 = dma.vmem_to_hbm [thread:$0]  %s1927_s27, 1024, %s3247_s1, [#allocation4], %s2000_s16, %s2000_s16, %s2001_s17  }
 0x218   :  { %1997 = dma.done.wait [#allocation4], 1024  }
 0x219   :  { %1998 = vsyncadd [#allocation4], 4294966272 }
 0x21a   :  { %1936 = vsyncpa [#allocation3], 1 }
 0x21b   :  { %1937 = vsyncpa [#allocation4], 1 }

</bundles_post_ra>
